<compile_context>
chip_gen: v6e
topology: v6e:2x2x1
jax: 0.10.0
libtpu: 0.0.40
codegen_flags: <defaults>
</compile_context>

<pallas_src>
from functools import partial

import jax
import jax.numpy as jnp
from jax import lax
from jax.experimental import pallas as pl
from jax.experimental.pallas import tpu as pltpu

LANE = 128         # lane width; logits padded up to this (n_actions, n_transitions <= 128)
MAX_STEPS = 128    # static bound on the geometric-stopping while-loop
NEG_INF = -1e30


def _log_sigmoid(x):
    return jnp.minimum(x, 0.0) - jnp.log(1.0 + jnp.exp(-jnp.abs(x)))


def _log_softmax(logits):
    m = jnp.max(logits, axis=-1, keepdims=True)
    lse = m + jnp.log(jnp.sum(jnp.exp(logits - m), axis=-1, keepdims=True))
    return logits - lse


def _abstract_action_kernel(action_ref, trans_ref, cs_ref,
                            u_act_ref, u_bern_ref, u_trans_ref,
                            tokens_ref, ntok_ref, next_ref, logp_ref,
                            *, n_actions, n_transitions):
    # index helpers (int iota -> f32 so every reduction runs in f32)
    lane_row = lax.broadcasted_iota(jnp.int32, (1, LANE), 1)                       # (1, LANE)
    lane_row_f = lane_row.astype(jnp.float32)
    lane_f = lax.broadcasted_iota(jnp.int32, (MAX_STEPS, LANE), 1).astype(jnp.float32)
    step_f = lax.broadcasted_iota(jnp.int32, (MAX_STEPS, 1), 0).astype(jnp.float32)

    # ---- action categorical: all MAX_STEPS candidate tokens in one shot -----
    a_logits = jnp.where(lane_row < n_actions, action_ref[...], NEG_INF)           # (1, LANE)
    logp_a = _log_softmax(a_logits)                                                # (1, LANE)
    g = -jnp.log(-jnp.log(u_act_ref[...]))                                         # (MAX_STEPS, LANE) Gumbel
    scores = jnp.where(lane_f < n_actions, logp_a + g, NEG_INF)                    # (MAX_STEPS, LANE)
    mx = jnp.max(scores, axis=-1, keepdims=True)                                   # (MAX_STEPS, 1)
    tok_f = jnp.min(jnp.where(scores >= mx, lane_f, float(LANE)),
                    axis=-1, keepdims=True)                                        # (MAX_STEPS, 1) argmax
    tok_logp = jnp.sum(jnp.where(lane_f == tok_f, logp_a, 0.0),
                       axis=-1, keepdims=True)                                     # (MAX_STEPS, 1)

    # ---- Bernoulli stopping: stop step + per-step logprob, vectorized -------
    cs = cs_ref[...]                                                               # (1, 1)
    p_stop = 1.0 / (1.0 + jnp.exp(-cs))
    log_p_stop = _log_sigmoid(cs)        # log P(change_state == 1)
    log_p_cont = _log_sigmoid(-cs)       # log P(change_state == 0)
    b = u_bern_ref[...] < p_stop                                                   # (MAX_STEPS, 1) bool
    first_stop = jnp.min(jnp.where(b, step_f, float(MAX_STEPS)),
                         axis=0, keepdims=True)                                    # (1, 1)
    n_stop = jnp.minimum(first_stop + 1.0, float(MAX_STEPS))                       # (1, 1)
    active = step_f < n_stop                                                       # (MAX_STEPS, 1) bool
    bern_logp = jnp.where(step_f == first_stop, log_p_stop, log_p_cont)            # (MAX_STEPS, 1)
    step_logp = jnp.where(active, tok_logp + bern_logp, 0.0)                       # (MAX_STEPS, 1)

    # ---- transition categorical (single row) --------------------------------
    t_logits = jnp.where(lane_row < n_transitions, trans_ref[...], NEG_INF)        # (1, LANE)
    logp_t = _log_softmax(t_logits)
    gt = -jnp.log(-jnp.log(u_trans_ref[...]))                                      # (1, LANE)
    t_scores = jnp.where(lane_row < n_transitions, logp_t + gt, NEG_INF)
    t_mx = jnp.max(t_scores, axis=-1, keepdims=True)
    nxt_f = jnp.min(jnp.where(t_scores >= t_mx, lane_row_f, float(LANE)),
                    axis=-1, keepdims=True)                                        # (1, 1)
    t_logp = jnp.sum(jnp.where(lane_row_f == nxt_f, logp_t, 0.0),
                     axis=-1, keepdims=True)                                       # (1, 1)

    # ---- outputs (single stores; no per-step RMW) ----------------------------
    tokens_ref[...] = jnp.where(active, tok_f.astype(jnp.int32), -1)
    ntok_ref[...] = n_stop.astype(jnp.int32)
    next_ref[...] = nxt_f.astype(jnp.int32)
    logp_ref[...] = jnp.sum(step_logp, axis=0, keepdims=True) + t_logp


@partial(jax.jit, static_argnames=("n_actions", "n_transitions"))
def _abstract_action_sample(key, action_params, transition_params, change_state,
                            *, n_actions, n_transitions):
    assert 1 <= n_actions <= LANE and 1 <= n_transitions <= LANE

    k_act, k_bern, k_trans = jax.random.split(key, 3)
    # one block draw for all categorical samples, one vector for all Bernoulli draws
    u_act = jax.random.uniform(k_act, (MAX_STEPS, LANE), jnp.float32,
                               minval=1e-7, maxval=1.0)
    u_bern = jax.random.uniform(k_bern, (MAX_STEPS, 1), jnp.float32)
    u_trans = jax.random.uniform(k_trans, (1, LANE), jnp.float32,
                                 minval=1e-7, maxval=1.0)

    a = jnp.zeros((1, LANE), jnp.float32).at[0, :n_actions].set(
        action_params.astype(jnp.float32))
    t = jnp.zeros((1, LANE), jnp.float32).at[0, :n_transitions].set(
        transition_params.astype(jnp.float32))
    cs = change_state.astype(jnp.float32).reshape(1, 1)

    out_shape = (
        jax.ShapeDtypeStruct((MAX_STEPS, 1), jnp.int32),   # sampled tokens (-1 pad)
        jax.ShapeDtypeStruct((1, 1), jnp.int32),           # number of tokens
        jax.ShapeDtypeStruct((1, 1), jnp.int32),           # next_state
        jax.ShapeDtypeStruct((1, 1), jnp.float32),         # total logprob
    )
    vmem = pl.BlockSpec(memory_space=pltpu.MemorySpace.VMEM)
    return pl.pallas_call(
        partial(_abstract_action_kernel,
                n_actions=n_actions, n_transitions=n_transitions),
        out_shape=out_shape,
        in_specs=[vmem, vmem, vmem, vmem, vmem, vmem],
        out_specs=(vmem, vmem, vmem, vmem),
    )(a, t, cs, u_act, u_bern, u_trans)


def abstract_action_v2_forward(key, action_params, transition_params,
                               change_state, name="op"):
    tokens, ntok, nxt, logp = _abstract_action_sample(
        key,
        jnp.asarray(action_params, jnp.float32),
        jnp.asarray(transition_params, jnp.float32),
        jnp.asarray(change_state, jnp.float32),
        n_actions=int(action_params.shape[0]),
        n_transitions=int(transition_params.shape[0]),
    )
    # NOTE: the host-side dict conversion below syncs; for throughput, batch
    # many samples into one kernel call and keep results on-device.
    n = int(ntok[0, 0])
    toks_host = jax.device_get(tokens[:n, 0])
    return {
        "tokens": [int(x) for x in toks_host],
        "next_state": int(nxt[0, 0]),
        "logprob": logp[0, 0],
        "AbstractActionName": name,
    }


if __name__ == "__main__":
    key = jax.random.PRNGKey(0)
    kp1, kp2, kp3, ksample = jax.random.split(key, 4)

    # module __init__: n_low_level_actions / n_transitions logits + 1 Bernoulli logit
    n_low_level_actions = 8
    n_transitions = 8
    action_params = jax.random.normal(kp1, (n_low_level_actions,), jnp.float32)
    transition_params = jax.random.normal(kp2, (n_transitions,), jnp.float32)
    change_state = jax.random.normal(kp3, (1,), jnp.float32)

    sample = abstract_action_v2_forward(
        ksample, action_params, transition_params, change_state, name="op")
    jax.block_until_ready(sample["logprob"])

    # basic sanity checks mirroring the PyTorch forward semantics
    assert 1 <= len(sample["tokens"]) <= MAX_STEPS
    assert all(0 <= tok < n_low_level_actions for tok in sample["tokens"])
    assert 0 <= sample["next_state"] < n_transitions
    assert bool(jnp.isfinite(sample["logprob"]))

    print("KERNEL_OK")
</pallas_src>

<mosaic_0001>
module attributes {stable_mosaic.version = 11 : i64} {
  func.func @_abstract_action_kernel(%arg0: memref<1x128xf32, #tpu.memory_space<vmem>>, %arg1: memref<1x128xf32, #tpu.memory_space<vmem>>, %arg2: memref<1x1xf32, #tpu.memory_space<vmem>>, %arg3: memref<128x128xf32, #tpu.memory_space<vmem>>, %arg4: memref<128x1xf32, #tpu.memory_space<vmem>>, %arg5: memref<1x128xf32, #tpu.memory_space<vmem>>, %arg6: memref<128x1xi32, #tpu.memory_space<vmem>>, %arg7: memref<1x1xi32, #tpu.memory_space<vmem>>, %arg8: memref<1x1xi32, #tpu.memory_space<vmem>>, %arg9: memref<1x1xf32, #tpu.memory_space<vmem>>) attributes {dimension_semantics = [], scalar_prefetch = 0 : i64, scratch_operands = 0 : i64, tpu.core_type = #tpu.core_type<tc>} {
    %0 = tpu.iota {dimensions = array<i32: 1>} : vector<1x128xi32>
    %1 = arith.sitofp %0 : vector<1x128xi32> to vector<1x128xf32>
    %2 = tpu.iota {dimensions = array<i32: 1>} : vector<128x128xi32>
    %3 = arith.sitofp %2 : vector<128x128xi32> to vector<128x128xf32>
    %4 = tpu.iota {dimensions = array<i32: 0>} : vector<128x1xi32>
    %5 = arith.sitofp %4 : vector<128x1xi32> to vector<128x1xf32>
    %c8_i32 = arith.constant 8 : i32
    %6 = vector.broadcast %c8_i32 : i32 to vector<1x128xi32>
    %7 = arith.cmpi slt, %0, %6 : vector<1x128xi32>
    %c0 = arith.constant 0 : index
    %c0_0 = arith.constant 0 : index
    %8 = vector.load %arg0[%c0, %c0_0] : memref<1x128xf32, #tpu.memory_space<vmem>>, vector<1x128xf32>
    %cst = arith.constant -1.000000e+30 : f32
    %9 = vector.broadcast %cst : f32 to vector<1x128xf32>
    %10 = arith.select %7, %8, %9 : vector<1x128xi1>, vector<1x128xf32>
    %cst_1 = arith.constant dense<0xFF800000> : vector<1xf32>
    %11 = vector.multi_reduction <maximumf>, %10, %cst_1 [1] : vector<1x128xf32> to vector<1xf32>
    %12 = vector.shape_cast %11 : vector<1xf32> to vector<1x1xf32>
    %13 = vector.broadcast %12 : vector<1x1xf32> to vector<1x128xf32>
    %14 = arith.subf %10, %13 : vector<1x128xf32>
    %15 = math.exp %14 : vector<1x128xf32>
    %cst_2 = arith.constant dense<0.000000e+00> : vector<1xf32>
    %16 = vector.multi_reduction <add>, %15, %cst_2 [1] : vector<1x128xf32> to vector<1xf32>
    %17 = vector.shape_cast %16 : vector<1xf32> to vector<1x1xf32>
    %18 = math.log %17 : vector<1x1xf32>
    %19 = arith.addf %12, %18 : vector<1x1xf32>
    %20 = vector.broadcast %19 : vector<1x1xf32> to vector<1x128xf32>
    %21 = arith.subf %10, %20 : vector<1x128xf32>
    %c0_3 = arith.constant 0 : index
    %c0_4 = arith.constant 0 : index
    %22 = vector.load %arg3[%c0_3, %c0_4] : memref<128x128xf32, #tpu.memory_space<vmem>>, vector<128x128xf32>
    %23 = math.log %22 : vector<128x128xf32>
    %cst_5 = arith.constant 0.000000e+00 : f32
    %24 = vector.broadcast %cst_5 : f32 to vector<128x128xf32>
    %25 = arith.subf %24, %23 : vector<128x128xf32>
    %26 = math.log %25 : vector<128x128xf32>
    %cst_6 = arith.constant 0.000000e+00 : f32
    %27 = vector.broadcast %cst_6 : f32 to vector<128x128xf32>
    %28 = arith.subf %27, %26 : vector<128x128xf32>
    %cst_7 = arith.constant 8.000000e+00 : f32
    %29 = vector.broadcast %cst_7 : f32 to vector<128x128xf32>
    %30 = arith.cmpf olt, %3, %29 : vector<128x128xf32>
    %31 = vector.broadcast %21 : vector<1x128xf32> to vector<128x128xf32>
    %32 = arith.addf %31, %28 : vector<128x128xf32>
    %cst_8 = arith.constant -1.000000e+30 : f32
    %33 = vector.broadcast %cst_8 : f32 to vector<128x128xf32>
    %34 = arith.select %30, %32, %33 : vector<128x128xi1>, vector<128x128xf32>
    %cst_9 = arith.constant dense<0xFF800000> : vector<128xf32>
    %35 = vector.multi_reduction <maximumf>, %34, %cst_9 [1] : vector<128x128xf32> to vector<128xf32>
    %36 = vector.shape_cast %35 : vector<128xf32> to vector<128x1xf32>
    %37 = vector.broadcast %36 : vector<128x1xf32> to vector<128x128xf32>
    %38 = arith.cmpf oge, %34, %37 : vector<128x128xf32>
    %cst_10 = arith.constant 1.280000e+02 : f32
    %39 = vector.broadcast %cst_10 : f32 to vector<128x128xf32>
    %40 = arith.select %38, %3, %39 : vector<128x128xi1>, vector<128x128xf32>
    %cst_11 = arith.constant dense<0x7F800000> : vector<128xf32>
    %41 = vector.multi_reduction <minimumf>, %40, %cst_11 [1] : vector<128x128xf32> to vector<128xf32>
    %42 = vector.shape_cast %41 : vector<128xf32> to vector<128x1xf32>
    %43 = vector.broadcast %42 : vector<128x1xf32> to vector<128x128xf32>
    %44 = arith.cmpf oeq, %3, %43 : vector<128x128xf32>
    %cst_12 = arith.constant 0.000000e+00 : f32
    %45 = vector.shape_cast %21 : vector<1x128xf32> to vector<1x128xf32>
    %46 = vector.broadcast %45 : vector<1x128xf32> to vector<128x128xf32>
    %47 = vector.broadcast %cst_12 : f32 to vector<128x128xf32>
    %48 = arith.select %44, %46, %47 : vector<128x128xi1>, vector<128x128xf32>
    %cst_13 = arith.constant dense<0.000000e+00> : vector<128xf32>
    %49 = vector.multi_reduction <add>, %48, %cst_13 [1] : vector<128x128xf32> to vector<128xf32>
    %50 = vector.shape_cast %49 : vector<128xf32> to vector<128x1xf32>
    %c0_14 = arith.constant 0 : index
    %c0_15 = arith.constant 0 : index
    %51 = vector.load %arg2[%c0_14, %c0_15] : memref<1x1xf32, #tpu.memory_space<vmem>>, vector<1x1xf32>
    %cst_16 = arith.constant 0.000000e+00 : f32
    %52 = vector.broadcast %cst_16 : f32 to vector<1x1xf32>
    %53 = arith.subf %52, %51 : vector<1x1xf32>
    %54 = math.exp %53 : vector<1x1xf32>
    %cst_17 = arith.constant 1.000000e+00 : f32
    %55 = vector.broadcast %cst_17 : f32 to vector<1x1xf32>
    %56 = arith.addf %55, %54 : vector<1x1xf32>
    %cst_18 = arith.constant 1.000000e+00 : f32
    %57 = vector.broadcast %cst_18 : f32 to vector<1x1xf32>
    %58 = arith.divf %57, %56 : vector<1x1xf32>
    %cst_19 = arith.constant 0.000000e+00 : f32
    %59 = vector.broadcast %cst_19 : f32 to vector<1x1xf32>
    %60 = arith.minimumf %51, %59 : vector<1x1xf32>
    %61 = math.absf %51 : vector<1x1xf32>
    %cst_20 = arith.constant 0.000000e+00 : f32
    %62 = vector.broadcast %cst_20 : f32 to vector<1x1xf32>
    %63 = arith.subf %62, %61 : vector<1x1xf32>
    %64 = math.exp %63 : vector<1x1xf32>
    %cst_21 = arith.constant 1.000000e+00 : f32
    %65 = vector.broadcast %cst_21 : f32 to vector<1x1xf32>
    %66 = arith.addf %65, %64 : vector<1x1xf32>
    %67 = math.log %66 : vector<1x1xf32>
    %68 = arith.subf %60, %67 : vector<1x1xf32>
    %cst_22 = arith.constant 0.000000e+00 : f32
    %69 = vector.broadcast %cst_22 : f32 to vector<1x1xf32>
    %70 = arith.subf %69, %51 : vector<1x1xf32>
    %cst_23 = arith.constant 0.000000e+00 : f32
    %71 = vector.broadcast %cst_23 : f32 to vector<1x1xf32>
    %72 = arith.minimumf %70, %71 : vector<1x1xf32>
    %73 = math.absf %70 : vector<1x1xf32>
    %cst_24 = arith.constant 0.000000e+00 : f32
    %74 = vector.broadcast %cst_24 : f32 to vector<1x1xf32>
    %75 = arith.subf %74, %73 : vector<1x1xf32>
    %76 = math.exp %75 : vector<1x1xf32>
    %cst_25 = arith.constant 1.000000e+00 : f32
    %77 = vector.broadcast %cst_25 : f32 to vector<1x1xf32>
    %78 = arith.addf %77, %76 : vector<1x1xf32>
    %79 = math.log %78 : vector<1x1xf32>
    %80 = arith.subf %72, %79 : vector<1x1xf32>
    %c0_26 = arith.constant 0 : index
    %c0_27 = arith.constant 0 : index
    %81 = vector.load %arg4[%c0_26, %c0_27] : memref<128x1xf32, #tpu.memory_space<vmem>>, vector<128x1xf32>
    %82 = vector.broadcast %58 : vector<1x1xf32> to vector<128x1xf32>
    %83 = arith.cmpf olt, %81, %82 : vector<128x1xf32>
    %cst_28 = arith.constant 1.280000e+02 : f32
    %84 = vector.broadcast %cst_28 : f32 to vector<128x1xf32>
    %85 = arith.select %83, %5, %84 : vector<128x1xi1>, vector<128x1xf32>
    %cst_29 = arith.constant dense<0x7F800000> : vector<1xf32>
    %86 = vector.multi_reduction <minimumf>, %85, %cst_29 [0] : vector<128x1xf32> to vector<1xf32>
    %87 = vector.shape_cast %86 : vector<1xf32> to vector<1x1xf32>
    %cst_30 = arith.constant 1.000000e+00 : f32
    %88 = vector.broadcast %cst_30 : f32 to vector<1x1xf32>
    %89 = arith.addf %87, %88 : vector<1x1xf32>
    %cst_31 = arith.constant 1.280000e+02 : f32
    %90 = vector.broadcast %cst_31 : f32 to vector<1x1xf32>
    %91 = arith.minimumf %89, %90 : vector<1x1xf32>
    %92 = vector.broadcast %91 : vector<1x1xf32> to vector<128x1xf32>
    %93 = arith.cmpf olt, %5, %92 : vector<128x1xf32>
    %94 = vector.broadcast %87 : vector<1x1xf32> to vector<128x1xf32>
    %95 = arith.cmpf oeq, %5, %94 : vector<128x1xf32>
    %96 = vector.shape_cast %68 : vector<1x1xf32> to vector<1x1xf32>
    %97 = vector.broadcast %96 : vector<1x1xf32> to vector<128x1xf32>
    %98 = vector.shape_cast %80 : vector<1x1xf32> to vector<1x1xf32>
    %99 = vector.broadcast %98 : vector<1x1xf32> to vector<128x1xf32>
    %100 = arith.select %95, %97, %99 : vector<128x1xi1>, vector<128x1xf32>
    %101 = arith.addf %50, %100 : vector<128x1xf32>
    %cst_32 = arith.constant 0.000000e+00 : f32
    %102 = vector.broadcast %cst_32 : f32 to vector<128x1xf32>
    %103 = arith.select %93, %101, %102 : vector<128x1xi1>, vector<128x1xf32>
    %c8_i32_33 = arith.constant 8 : i32
    %104 = vector.broadcast %c8_i32_33 : i32 to vector<1x128xi32>
    %105 = arith.cmpi slt, %0, %104 : vector<1x128xi32>
    %c0_34 = arith.constant 0 : index
    %c0_35 = arith.constant 0 : index
    %106 = vector.load %arg1[%c0_34, %c0_35] : memref<1x128xf32, #tpu.memory_space<vmem>>, vector<1x128xf32>
    %cst_36 = arith.constant -1.000000e+30 : f32
    %107 = vector.broadcast %cst_36 : f32 to vector<1x128xf32>
    %108 = arith.select %105, %106, %107 : vector<1x128xi1>, vector<1x128xf32>
    %cst_37 = arith.constant dense<0xFF800000> : vector<1xf32>
    %109 = vector.multi_reduction <maximumf>, %108, %cst_37 [1] : vector<1x128xf32> to vector<1xf32>
    %110 = vector.shape_cast %109 : vector<1xf32> to vector<1x1xf32>
    %111 = vector.broadcast %110 : vector<1x1xf32> to vector<1x128xf32>
    %112 = arith.subf %108, %111 : vector<1x128xf32>
    %113 = math.exp %112 : vector<1x128xf32>
    %cst_38 = arith.constant dense<0.000000e+00> : vector<1xf32>
    %114 = vector.multi_reduction <add>, %113, %cst_38 [1] : vector<1x128xf32> to vector<1xf32>
    %115 = vector.shape_cast %114 : vector<1xf32> to vector<1x1xf32>
    %116 = math.log %115 : vector<1x1xf32>
    %117 = arith.addf %110, %116 : vector<1x1xf32>
    %118 = vector.broadcast %117 : vector<1x1xf32> to vector<1x128xf32>
    %119 = arith.subf %108, %118 : vector<1x128xf32>
    %c0_39 = arith.constant 0 : index
    %c0_40 = arith.constant 0 : index
    %120 = vector.load %arg5[%c0_39, %c0_40] : memref<1x128xf32, #tpu.memory_space<vmem>>, vector<1x128xf32>
    %121 = math.log %120 : vector<1x128xf32>
    %cst_41 = arith.constant 0.000000e+00 : f32
    %122 = vector.broadcast %cst_41 : f32 to vector<1x128xf32>
    %123 = arith.subf %122, %121 : vector<1x128xf32>
    %124 = math.log %123 : vector<1x128xf32>
    %cst_42 = arith.constant 0.000000e+00 : f32
    %125 = vector.broadcast %cst_42 : f32 to vector<1x128xf32>
    %126 = arith.subf %125, %124 : vector<1x128xf32>
    %c8_i32_43 = arith.constant 8 : i32
    %127 = vector.broadcast %c8_i32_43 : i32 to vector<1x128xi32>
    %128 = arith.cmpi slt, %0, %127 : vector<1x128xi32>
    %129 = arith.addf %119, %126 : vector<1x128xf32>
    %cst_44 = arith.constant -1.000000e+30 : f32
    %130 = vector.broadcast %cst_44 : f32 to vector<1x128xf32>
    %131 = arith.select %128, %129, %130 : vector<1x128xi1>, vector<1x128xf32>
    %cst_45 = arith.constant dense<0xFF800000> : vector<1xf32>
    %132 = vector.multi_reduction <maximumf>, %131, %cst_45 [1] : vector<1x128xf32> to vector<1xf32>
    %133 = vector.shape_cast %132 : vector<1xf32> to vector<1x1xf32>
    %134 = vector.broadcast %133 : vector<1x1xf32> to vector<1x128xf32>
    %135 = arith.cmpf oge, %131, %134 : vector<1x128xf32>
    %cst_46 = arith.constant 1.280000e+02 : f32
    %136 = vector.broadcast %cst_46 : f32 to vector<1x128xf32>
    %137 = arith.select %135, %1, %136 : vector<1x128xi1>, vector<1x128xf32>
    %cst_47 = arith.constant dense<0x7F800000> : vector<1xf32>
    %138 = vector.multi_reduction <minimumf>, %137, %cst_47 [1] : vector<1x128xf32> to vector<1xf32>
    %139 = vector.shape_cast %138 : vector<1xf32> to vector<1x1xf32>
    %140 = vector.broadcast %139 : vector<1x1xf32> to vector<1x128xf32>
    %141 = arith.cmpf oeq, %1, %140 : vector<1x128xf32>
    %cst_48 = arith.constant 0.000000e+00 : f32
    %142 = vector.broadcast %cst_48 : f32 to vector<1x128xf32>
    %143 = arith.select %141, %119, %142 : vector<1x128xi1>, vector<1x128xf32>
    %cst_49 = arith.constant dense<0.000000e+00> : vector<1xf32>
    %144 = vector.multi_reduction <add>, %143, %cst_49 [1] : vector<1x128xf32> to vector<1xf32>
    %145 = vector.shape_cast %144 : vector<1xf32> to vector<1x1xf32>
    %146 = arith.fptosi %42 : vector<128x1xf32> to vector<128x1xi32>
    %c-1_i32 = arith.constant -1 : i32
    %147 = vector.broadcast %c-1_i32 : i32 to vector<128x1xi32>
    %148 = arith.select %93, %146, %147 : vector<128x1xi1>, vector<128x1xi32>
    %c0_50 = arith.constant 0 : index
    %c0_51 = arith.constant 0 : index
    %149 = vector.load %arg6[%c0_50, %c0_51] : memref<128x1xi32, #tpu.memory_space<vmem>>, vector<128x1xi32>
    tpu.vector_store %arg6[%c0_50, %c0_51], %148 {strides = array<i32>} : memref<128x1xi32, #tpu.memory_space<vmem>>, vector<128x1xi32>,
    %150 = arith.fptosi %91 : vector<1x1xf32> to vector<1x1xi32>
    %c0_52 = arith.constant 0 : index
    %c0_53 = arith.constant 0 : index
    %151 = vector.load %arg7[%c0_52, %c0_53] : memref<1x1xi32, #tpu.memory_space<vmem>>, vector<1x1xi32>
    tpu.vector_store %arg7[%c0_52, %c0_53], %150 {strides = array<i32>} : memref<1x1xi32, #tpu.memory_space<vmem>>, vector<1x1xi32>,
    %152 = arith.fptosi %139 : vector<1x1xf32> to vector<1x1xi32>
    %c0_54 = arith.constant 0 : index
    %c0_55 = arith.constant 0 : index
    %153 = vector.load %arg8[%c0_54, %c0_55] : memref<1x1xi32, #tpu.memory_space<vmem>>, vector<1x1xi32>
    tpu.vector_store %arg8[%c0_54, %c0_55], %152 {strides = array<i32>} : memref<1x1xi32, #tpu.memory_space<vmem>>, vector<1x1xi32>,
    %cst_56 = arith.constant dense<0.000000e+00> : vector<1xf32>
    %154 = vector.multi_reduction <add>, %103, %cst_56 [0] : vector<128x1xf32> to vector<1xf32>
    %155 = vector.shape_cast %154 : vector<1xf32> to vector<1x1xf32>
    %156 = arith.addf %155, %145 : vector<1x1xf32>
    %c0_57 = arith.constant 0 : index
    %c0_58 = arith.constant 0 : index
    %157 = vector.load %arg9[%c0_57, %c0_58] : memref<1x1xf32, #tpu.memory_space<vmem>>, vector<1x1xf32>
    tpu.vector_store %arg9[%c0_57, %c0_58], %156 {strides = array<i32>} : memref<1x1xf32, #tpu.memory_space<vmem>>, vector<1x1xf32>,
    return
  }
}

</mosaic_0001>

<bundles_post_ra>
// kernel: _abstract_action_sample.3
= control target key start
LH: loop header
LB: loop body
LE: loop exit
PB: predicated region body
PF: predicated region fallthrough
CT: control target
= control target key end

     0   :  { %s1755_s0 = inlined_call_operand.vmem [shape: f32[1,128], index: 0, kind: input, shape index: {}]   ;;  %s1756_s1 = inlined_call_operand.vmem [shape: f32[1,128], index: 1, kind: input, shape index: {}]   ;;  %s1757_s2 = inlined_call_operand.<no memory space> [shape: f32[1,1], index: 2, kind: input, shape index: {}]   ;;  %s1758_s3 = inlined_call_operand.vmem [shape: f32[128,128], index: 3, kind: input, shape index: {}]   ;;  %s1759_s4 = inlined_call_operand.vmem [shape: f32[128,1], index: 4, kind: input, shape index: {}]   ;;  %s1760_s5 = inlined_call_operand.vmem [shape: f32[1,128], index: 5, kind: input, shape index: {}]   ;;  %s1761_s6 = inlined_call_operand.vmem [shape: s32[128,1], index: 6, kind: output, shape index: {0}]   ;;  %s1762_s7 = inlined_call_operand.hbm [shape: s32[1,1], index: 7, kind: output, shape index: {1}]   ;;  %s1763_s8 = inlined_call_operand.hbm [shape: s32[1,1], index: 8, kind: output, shape index: {2}]   ;;  %s1764_s9 = inlined_call_operand.hbm [shape: f32[1,1], index: 9, kind: output, shape index: {3}]  }
   0x1   :  { %v15_v0 = vstv %s1757_s2 }
   0x2   :  { %16 = vst [vmem:[#allocation2] sm:$0x1] %v15_v0 }
   0x3   :  { %17 = vsyncpa [#allocation4], 0  ;;  %v31_v1 = vlaneseq }
   0x4   :  { %18 = vsyncpa [#allocation6], 0  ;;  %v68_v3 = vld [vmem:[%s1755_s0] sm:$0x1]  ;;  %vm70_vm0 = vcmask 1040384   ;;  %v85_v19 = vld [vmem:[%s1758_s3 + $0x8] sm:$0xff] }
   0x5   :  { %v1026_v2 = vand.u32 127, %v31_v1  ;;  %v604_v4 = vld [vmem:[%s1756_s1] sm:$0x1]  ;;  %v87_v21 = vld [vmem:[%s1758_s3 + $0x18] sm:$0xff]  ;;  %v86_v22 = vld [vmem:[%s1758_s3 + $0x10] sm:$0xff]  ;;  %s969_s30 = smov [#allocation5]  }
   0x6   :  { %v84_v20 = vld [vmem:[%s1758_s3] sm:$0xff]  ;;  %v89_v23 = vld [vmem:[%s1758_s3 + $0x28] sm:$0xff]  ;;  %v91_v25 = vld [vmem:[%s1758_s3 + $0x38] sm:$0xff]  ;;  %s751_s10 = sshll.u32 %s969_s30, 4  ;;  %s752_s10 = int_to_ptr.vmem [resolvable:$true] %s751_s10 }
   0x7   :  { %vm67_vm1 = vcmp.lt.s32.totalorder %v1026_v2, 8  ;;  %v88_v24 = vld [vmem:[%s1758_s3 + $0x20] sm:$0xff]  ;;  %v90_v26 = vld [vmem:[%s1758_s3 + $0x30] sm:$0xff]  ;;  %v93_v27 = vld [vmem:[%s1758_s3 + $0x48] sm:$0xff]  ;;  %s905_s11 = scalar_lea.vmem %s752_s10, 16  ;;  %s909_s12 = scalar_lea.vmem %s752_s10, 32 }
   0x8   :  { %v1037_v5 = vsel %vm67_vm1, %v68_v3, -1e+30  ;;  %v1041_v6 = vsel %vm67_vm1, %v604_v4, -1e+30  ;;  %v92_v28 = vld [vmem:[%s1758_s3 + $0x40] sm:$0xff]  ;;  %v95_v32 = vld [vmem:[%s1758_s3 + $0x58] sm:$0xff]  ;;  %p906_p0 = scmp.ne.s32.totalorder %s752_s10, %s905_s11  ;;  %p910_p1 = scmp.lt.s32.totalorder %s752_s10, %s752_s10 }
   0x9   :  { %v71_v7 = vsel %vm70_vm0, %v1037_v5, -inf  ;;  %v606_v8 = vsel %vm70_vm0, %v1041_v6, -inf  ;;  %v94_v35 = vld [vmem:[%s1758_s3 + $0x50] sm:$0xff]  ;;  %v97_v37 = vld [vmem:[%s1758_s3 + $0x68] sm:$0xff]  ;;  %v96_v39 = vld [vmem:[%s1758_s3 + $0x60] sm:$0xff]  ;;  %p911_p2 = scmp.lt.s32.totalorder %s909_s12, %s905_s11 }
   0xa   :  { %72 = vmax.xlane.f32.xlu0 %v71_v7  ;;  %v99_v42 = vld [vmem:[%s1758_s3 + $0x78] sm:$0xff]  ;;  %v98_v45 = vld [vmem:[%s1758_s3 + $0x70] sm:$0xff]  ;;  %v619_v55 = vld [vmem:[%s1760_s5] sm:$0x1] }
   0xb   :  { %p912_p3 = por %p911_p2, %p910_p1 }
   0xd   :  { %p913_p4 = pnand %p912_p3, %p906_p0 }
   0xe   :  { %607 = vmax.xlane.f32.xlu0 %v606_v8 }
  0x93   :  { %v1047_v9 = vpop.xlane.xlu0 %72 }
  0x94   :  { %v74_v10 = vsub.f32 %v1037_v5, %v1047_v9 }
  0x96   :  { %v75_v11 = vmul.f32 1.442695, %v74_v10 }
  0x97   :  { %v1051_v12 = vpop.xlane.xlu0 %607 }
  0x98   :  { %817 = vpow2.f32 %v75_v11  ;;  %v609_v13 = vsub.f32 %v1041_v6, %v1051_v12 }
  0x9a   :  { %v610_v14 = vmul.f32 1.442695, %v609_v13 }
  0x9c   :  { %819 = vpow2.f32 %v610_v14 }
  0x9d   :  { %821 = vlog2.f32 %v85_v19 }
  0x9e   :  { %823 = vlog2.f32 %v84_v20 }
  0x9f   :  { %825 = vlog2.f32 %v87_v21 }
  0xa0   :  { %827 = vlog2.f32 %v86_v22  ;;  %v1109_v22 = vshrl.u32 %v31_v1, 7 }
  0xa1   :  { %829 = vlog2.f32 %v89_v23 }
  0xa2   :  { %831 = vlog2.f32 %v88_v24 }
  0xa3   :  { %833 = vlog2.f32 %v91_v25 }
  0xa4   :  { %835 = vlog2.f32 %v90_v26 }
  0xa5   :  { %v818_v15 = vpop.eup %817  ;;  %837 = vlog2.f32 %v93_v27 }
  0xa6   :  { %v77_v16 = vsel %vm70_vm0, %v818_v15, 0.0  ;;  %839 = vlog2.f32 %v92_v28 }
  0xa7   :  { %78 = vadd.xlane.f32.xlu1 %v77_v16  ;;  %841 = vlog2.f32 %v95_v32 }
  0xa8   :  { %843 = vlog2.f32 %v94_v35  ;;  %v1112_v35 = vsub.s32 0, %v1109_v22 }
  0xa9   :  { %v820_v17 = vpop.eup %819  ;;  %845 = vlog2.f32 %v97_v37 }
  0xaa   :  { %v612_v18 = vsel %vm70_vm0, %v820_v17, 0.0  ;;  %v822_v29 = vpop.eup %821  ;;  %847 = vlog2.f32 %v96_v39 }
  0xab   :  { %613 = vadd.xlane.f32.xlu1 %v612_v18  ;;  %v824_v30 = vpop.eup %823  ;;  %v103_v34 = vmul.f32 0.6931472, %v822_v29  ;;  %849 = vlog2.f32 %v99_v42 }
  0xac   :  { %v826_v31 = vpop.eup %825  ;;  %v101_v36 = vmul.f32 0.6931472, %v824_v30  ;;  %851 = vlog2.f32 %v98_v45 }
  0xad   :  { %v828_v33 = vpop.eup %827  ;;  %v107_v38 = vmul.f32 0.6931472, %v826_v31  ;;  %v133_v44 = vsub.f32 0.0, %v103_v34 }
  0xae   :  { %v830_v40 = vpop.eup %829  ;;  %v105_v41 = vmul.f32 0.6931472, %v828_v33  ;;  %v132_v46 = vsub.f32 0.0, %v101_v36 }
  0xaf   :  { %v832_v43 = vpop.eup %831  ;;  %v135_v47 = vsub.f32 0.0, %v107_v38  ;;  %v111_v48 = vmul.f32 0.6931472, %v830_v40  ;;  %853 = vlog2.f32 %v133_v44 }
  0xb0   :  { %v834_v49 = vpop.eup %833  ;;  %v134_v50 = vsub.f32 0.0, %v105_v41  ;;  %v109_v51 = vmul.f32 0.6931472, %v832_v43  ;;  %855 = vlog2.f32 %v132_v46  ;;  %v1116_v41 = vcvt.s32.f32 %v1026_v2 }
  0xb1   :  { %v836_v52 = vpop.eup %835  ;;  %857 = vlog2.f32 %v135_v47  ;;  %v137_v53 = vsub.f32 0.0, %v111_v48  ;;  %v115_v54 = vmul.f32 0.6931472, %v834_v49 }
  0xb2   :  { %v838_v56 = vpop.eup %837  ;;  %859 = vlog2.f32 %v134_v50  ;;  %v136_v58 = vsub.f32 0.0, %v109_v51  ;;  %v113_v59 = vmul.f32 0.6931472, %v836_v52  ;;  %vm196_vm2 = vcmp.lt.f32.partialorder %v1116_v41, 8.0 }
  0xb3   :  { %v840_v60 = vpop.eup %839  ;;  %v139_v61 = vsub.f32 0.0, %v115_v54  ;;  %v119_v62 = vmul.f32 0.6931472, %v838_v56 }
  0xb4   :  { %v842_v63 = vpop.eup %841  ;;  %v138_v0 = vsub.f32 0.0, %v113_v59  ;;  %v117_v3 = vmul.f32 0.6931472, %v840_v60 }
  0xb5   :  { %v844_v4 = vpop.eup %843  ;;  %v141_v10 = vsub.f32 0.0, %v119_v62  ;;  %v123_v11 = vmul.f32 0.6931472, %v842_v63 }
  0xb6   :  { %v846_v7 = vpop.eup %845  ;;  %v140_v14 = vsub.f32 0.0, %v117_v3  ;;  %v121_v15 = vmul.f32 0.6931472, %v844_v4 }
  0xb7   :  { %v848_v8 = vpop.eup %847  ;;  %v127_v18 = vmul.f32 0.6931472, %v846_v7  ;;  %v143_v20 = vsub.f32 0.0, %v123_v11 }
  0xb8   :  { %v850_v13 = vpop.eup %849  ;;  %v142_v23 = vsub.f32 0.0, %v121_v15  ;;  %v125_v24 = vmul.f32 0.6931472, %v848_v8 }
  0xb9   :  { %v852_v16 = vpop.eup %851  ;;  %v131_v26 = vmul.f32 0.6931472, %v850_v13  ;;  %v145_v28 = vsub.f32 0.0, %v127_v18 }
  0xba   :  { %v129_v29 = vmul.f32 0.6931472, %v852_v16  ;;  %v144_v1 = vsub.f32 0.0, %v125_v24 }
  0xbb   :  { %v147_v40 = vsub.f32 0.0, %v131_v26 }
  0xbc   :  { %v854_v17 = vpop.eup %853  ;;  %v146_v47 = vsub.f32 0.0, %v129_v29 }
  0xbd   :  { %v856_v19 = vpop.eup %855  ;;  %v151_v32 = vmul.f32 0.6931472, %v854_v17 }
  0xbe   :  { %v858_v21 = vpop.eup %857  ;;  %v149_v33 = vmul.f32 0.6931472, %v856_v19 }
  0xbf   :  { %v860_v25 = vpop.eup %859  ;;  %v155_v38 = vmul.f32 0.6931472, %v858_v21  ;;  %v181_v45 = vsub.f32 0.0, %v151_v32 }
  0xc0   :  { %v153_v39 = vmul.f32 0.6931472, %v860_v25  ;;  %v180_v46 = vsub.f32 0.0, %v149_v33 }
  0xc1   :  { %v183_v52 = vsub.f32 0.0, %v155_v38 }
 0x130   :  { %v79_v57 = vpop.xlane.xlu1 %78 }
 0x131   :  { %861 = vlog2.f32 %v79_v57 }
 0x132   :  { %863 = vlog2.f32 %v619_v55 }
 0x133   :  { %865 = vlog2.f32 %v137_v53  ;;  %v182_v53 = vsub.f32 0.0, %v153_v39 }
 0x134   :  { %867 = vlog2.f32 %v136_v58  ;;  %v614_v44 = vpop.xlane.xlu1 %613 }
 0x135   :  { %869 = vlog2.f32 %v139_v61 }
 0x136   :  { %871 = vlog2.f32 %v138_v0 }
 0x137   :  { %873 = vlog2.f32 %v141_v10 }
 0x138   :  { %875 = vlog2.f32 %v140_v14 }
 0x139   :  { %877 = vlog2.f32 %v143_v20 }
 0x13a   :  { %879 = vlog2.f32 %v142_v23 }
 0x13b   :  { %881 = vlog2.f32 %v145_v28 }
 0x13c   :  { %883 = vlog2.f32 %v144_v1 }
 0x13d   :  { %885 = vlog2.f32 %v147_v40 }
 0x13e   :  { %v862_v27 = vpop.eup %861  ;;  %887 = vlog2.f32 %v614_v44 }
 0x13f   :  { %v864_v30 = vpop.eup %863  ;;  %v81_v31 = vmul.f32 0.6931472, %v862_v27  ;;  %889 = vlog2.f32 %v146_v47 }
 0x140   :  { %v866_v34 = vpop.eup %865  ;;  %v621_v42 = vmul.f32 0.6931472, %v864_v30 }
 0x141   :  { %v868_v36 = vpop.eup %867  ;;  %v82_v37 = vadd.f32 %v81_v31, %v1047_v9  ;;  %v159_v49 = vmul.f32 0.6931472, %v866_v34 }
 0x142   :  { %v870_v48 = vpop.eup %869  ;;  %v157_v50 = vmul.f32 0.6931472, %v868_v36  ;;  %v622_v54 = vsub.f32 0.0, %v621_v42 }
 0x143   :  { %v83_v43 = vsub.f32 %v1037_v5, %v82_v37  ;;  %v872_v51 = vpop.eup %871  ;;  %v185_v57 = vsub.f32 0.0, %v159_v49  ;;  %v163_v59 = vmul.f32 0.6931472, %v870_v48 }
 0x144   :  { %v874_v56 = vpop.eup %873  ;;  %v184_v58 = vsub.f32 0.0, %v157_v50  ;;  %v161_v60 = vmul.f32 0.6931472, %v872_v51  ;;  %891 = vlog2.f32 %v622_v54 }
 0x145   :  { %v1120_v9 = vrot.slane %v83_v43, %v1112_v35  ;;  %v876_v61 = vpop.eup %875  ;;  %v187_v7 = vsub.f32 0.0, %v163_v59  ;;  %v167_v10 = vmul.f32 0.6931472, %v874_v56 }
 0x146   :  { %v878_v4 = vpop.eup %877  ;;  %v186_v8 = vsub.f32 0.0, %v161_v60  ;;  %v165_v11 = vmul.f32 0.6931472, %v876_v61 }
 0x147   :  { %v202_v5 = vadd.f32 %v1120_v9, %v181_v45  ;;  %v201_v55 = vadd.f32 %v1120_v9, %v180_v46  ;;  %v204_v0 = vadd.f32 %v1120_v9, %v183_v52  ;;  %v203_v3 = vadd.f32 %v1120_v9, %v182_v53  ;;  %v880_v13 = vpop.eup %879 }
 0x148   :  { %v206_v16 = vadd.f32 %v1120_v9, %v185_v57  ;;  %v205_v17 = vadd.f32 %v1120_v9, %v184_v58  ;;  %v882_v18 = vpop.eup %881  ;;  %v189_v19 = vsub.f32 0.0, %v167_v10  ;;  %v188_v20 = vsub.f32 0.0, %v165_v11 }
 0x149   :  { %v1127_v62 = vsel %vm196_vm2, %v202_v5, -1e+30  ;;  %v1131_v63 = vsel %vm196_vm2, %v201_v55, -1e+30  ;;  %v1139_v14 = vsel %vm196_vm2, %v204_v0, -1e+30  ;;  %v884_v24 = vpop.eup %883  ;;  %v208_v27 = vadd.f32 %v1120_v9, %v187_v7 }
 0x14a   :  { %235 = vmax.xlane.f32.xlu1 %v1127_v62  ;;  %233 = vmax.xlane.f32.xlu0 %v1131_v63  ;;  %v1143_v15 = vsel %vm196_vm2, %v203_v3, -1e+30  ;;  %v171_v21 = vmul.f32 0.6931472, %v878_v4  ;;  %v169_v23 = vmul.f32 0.6931472, %v880_v13  ;;  %v207_v28 = vadd.f32 %v1120_v9, %v186_v8  ;;  %v886_v29 = vpop.eup %885 }
 0x14b   :  { %v1151_v25 = vsel %vm196_vm2, %v206_v16, -1e+30  ;;  %v1155_v26 = vsel %vm196_vm2, %v205_v17, -1e+30  ;;  %v888_v30 = vpop.eup %887  ;;  %v175_v34 = vmul.f32 0.6931472, %v882_v18  ;;  %v210_v38 = vadd.f32 %v1120_v9, %v189_v19 }
 0x14c   :  { %v890_v31 = vpop.eup %889  ;;  %v191_v32 = vsub.f32 0.0, %v171_v21  ;;  %v190_v33 = vsub.f32 0.0, %v169_v23  ;;  %v173_v1 = vmul.f32 0.6931472, %v884_v24  ;;  %v1163_v36 = vsel %vm196_vm2, %v208_v27, -1e+30 }
 0x14d   :  { %v1167_v37 = vsel %vm196_vm2, %v207_v28, -1e+30  ;;  %v209_v39 = vadd.f32 %v1120_v9, %v188_v20  ;;  %v616_v40 = vmul.f32 0.6931472, %v888_v30  ;;  %v193_v43 = vsub.f32 0.0, %v175_v34 }
 0x14e   :  { %239 = vmax.xlane.f32.xlu1 %v1139_v14  ;;  %237 = vmax.xlane.f32.xlu0 %v1143_v15  ;;  %v192_v44 = vsub.f32 0.0, %v173_v1  ;;  %v179_v45 = vmul.f32 0.6931472, %v886_v29  ;;  %v177_v46 = vmul.f32 0.6931472, %v890_v31  ;;  %v212_v49 = vadd.f32 %v1120_v9, %v191_v32 }
 0x14f   :  { %v1175_v47 = vsel %vm196_vm2, %v210_v38, -1e+30  ;;  %v1179_v48 = vsel %vm196_vm2, %v209_v39, -1e+30  ;;  %v211_v50 = vadd.f32 %v1120_v9, %v190_v33  ;;  %v617_v51 = vadd.f32 %v616_v40, %v1051_v12  ;;  %v1258_v39 = vld [vmem:[#allocation2] sm:$0x1] }
 0x150   :  { %v195_v53 = vsub.f32 0.0, %v179_v45  ;;  %v194_v54 = vsub.f32 0.0, %v177_v46  ;;  %v1188_v5 = vsel %vm196_vm2, %v212_v49, -1e+30  ;;  %v214_v56 = vadd.f32 %v1120_v9, %v193_v43 }
 0x151   :  { %v892_v42 = vpop.eup %891  ;;  %v1192_v55 = vsel %vm196_vm2, %v211_v50, -1e+30  ;;  %v213_v57 = vadd.f32 %v1120_v9, %v192_v44  ;;  %v1199_v12 = vsub.f32 %v1041_v6, %v617_v51  ;;  %v1265_v43 = vsub.f32 0.0, %v1258_v39 }
 0x152   :  { %243 = vmax.xlane.f32.xlu1 %v1151_v25  ;;  %241 = vmax.xlane.f32.xlu0 %v1155_v26  ;;  %v624_v52 = vmul.f32 0.6931472, %v892_v42  ;;  %v1203_v59 = vsel %vm196_vm2, %v214_v56, -1e+30  ;;  %v216_v61 = vadd.f32 %v1120_v9, %v195_v53  ;;  %v215_v0 = vadd.f32 %v1120_v9, %v194_v54 }
 0x153   :  { %v1207_v60 = vsel %vm196_vm2, %v213_v57, -1e+30  ;;  %v36_v51 = vadd.s32 8, %v1109_v22  ;;  %v38_v53 = vadd.s32 24, %v1109_v22  ;;  %v39_v54 = vadd.s32 32, %v1109_v22 }
 0x154   :  { %v625_v58 = vsub.f32 0.0, %v624_v52  ;;  %v1216_v3 = vsel %vm196_vm2, %v216_v61, -1e+30  ;;  %v1220_v4 = vsel %vm196_vm2, %v215_v0, -1e+30  ;;  %v37_v52 = vadd.s32 16, %v1109_v22 }
 0x155   :  { %v42_v56 = vadd.s32 56, %v1109_v22  ;;  %v43_v57 = vadd.s32 64, %v1109_v22  ;;  %v46_v61 = vadd.s32 88, %v1109_v22  ;;  %v1286_v0 = vcvt.s32.f32 %v1109_v22 }
 0x156   :  { %247 = vmax.xlane.f32.xlu1 %v1163_v36  ;;  %245 = vmax.xlane.f32.xlu0 %v1167_v37  ;;  %v626_v6 = vadd.f32 %v625_v58, %v1199_v12 }
 0x158   :  { %v1226_v7 = vsel %vm67_vm1, %v626_v6, -1e+30  ;;  %v47_v6 = vadd.s32 96, %v1109_v22 }
 0x159   :  { %v628_v8 = vsel %vm70_vm0, %v1226_v7, -inf }
 0x15a   :  { %251 = vmax.xlane.f32.xlu1 %v1175_v47  ;;  %249 = vmax.xlane.f32.xlu0 %v1179_v48 }
 0x15e   :  { %255 = vmax.xlane.f32.xlu1 %v1188_v5  ;;  %253 = vmax.xlane.f32.xlu0 %v1192_v55 }
 0x162   :  { %259 = vmax.xlane.f32.xlu1 %v1203_v59  ;;  %257 = vmax.xlane.f32.xlu0 %v1207_v60 }
 0x166   :  { %263 = vmax.xlane.f32.xlu1 %v1216_v3  ;;  %261 = vmax.xlane.f32.xlu0 %v1220_v4 }
 0x16a   :  { %629 = vmax.xlane.f32.xlu0 %v628_v8  ;;  %v418_v8 = vld [vmem:[%s1759_s4] sm:$0xff] }
 0x1d3   :  { %v236_v10 = vpop.xlane.xlu1 %235  ;;  %v234_v11 = vpop.xlane.xlu0 %233 }
 0x1d4   :  { %vm266_vm3 = vcmp.ge.f32.partialorder %v1127_v62, %v236_v10  ;;  %vm265_vm4 = vcmp.ge.f32.partialorder %v1131_v63, %v234_v11  ;;  %v419_v10 = vld [vmem:[%s1759_s4 + $0x8] sm:$0xff]  ;;  %v48_v11 = vadd.s32 104, %v1109_v22 }
 0x1d5   :  { %v282_v13 = vsel %vm266_vm3, %v1116_v41, 128.0  ;;  %v281_v16 = vsel %vm265_vm4, %v1116_v41, 128.0 }
 0x1d6   :  { %299 = vmin.xlane.f32.xlu0 %v282_v13  ;;  %297 = vmin.xlane.f32.xlu1 %v281_v16  ;;  %v49_v13 = vadd.s32 112, %v1109_v22  ;;  %v50_v16 = vadd.s32 120, %v1109_v22 }
 0x1d7   :  { %v240_v17 = vpop.xlane.xlu1 %239  ;;  %v238_v2 = vpop.xlane.xlu0 %237 }
 0x1d8   :  { %vm268_vm5 = vcmp.ge.f32.partialorder %v1139_v14, %v240_v17  ;;  %vm267_vm6 = vcmp.ge.f32.partialorder %v1143_v15, %v238_v2  ;;  %v1304_v17 = vcvt.s32.f32 %v39_v54  ;;  %v420_v2 = vld [vmem:[%s1759_s4 + $0x10] sm:$0xff] }
 0x1d9   :  { %v284_v18 = vsel %vm268_vm5, %v1116_v41, 128.0  ;;  %v283_v19 = vsel %vm267_vm6, %v1116_v41, 128.0 }
 0x1da   :  { %303 = vmin.xlane.f32.xlu0 %v284_v18  ;;  %301 = vmin.xlane.f32.xlu1 %v283_v19  ;;  %v421_v18 = vld [vmem:[%s1759_s4 + $0x18] sm:$0xff]  ;;  %v422_v19 = vld [vmem:[%s1759_s4 + $0x20] sm:$0xff] }
 0x1db   :  { %v244_v62 = vpop.xlane.xlu1 %243  ;;  %v242_v63 = vpop.xlane.xlu0 %241 }
 0x1dc   :  { %vm270_vm7 = vcmp.ge.f32.partialorder %v1151_v25, %v244_v62  ;;  %vm269_vm8 = vcmp.ge.f32.partialorder %v1155_v26, %v242_v63 }
 0x1dd   :  { %v286_v20 = vsel %vm270_vm7, %v1116_v41, 128.0  ;;  %v285_v21 = vsel %vm269_vm8, %v1116_v41, 128.0 }
 0x1de   :  { %307 = vmin.xlane.f32.xlu0 %v286_v20  ;;  %305 = vmin.xlane.f32.xlu1 %v285_v21  ;;  %v1319_v20 = vcvt.s32.f32 %v42_v56  ;;  %v423_v21 = vld [vmem:[%s1759_s4 + $0x28] sm:$0xff] }
 0x1df   :  { %v248_v14 = vpop.xlane.xlu1 %247  ;;  %v246_v15 = vpop.xlane.xlu0 %245 }
 0x1e0   :  { %vm272_vm9 = vcmp.ge.f32.partialorder %v1163_v36, %v248_v14  ;;  %vm271_vm10 = vcmp.ge.f32.partialorder %v1167_v37, %v246_v15  ;;  %v424_v14 = vld [vmem:[%s1759_s4 + $0x30] sm:$0xff]  ;;  %v425_v15 = vld [vmem:[%s1759_s4 + $0x38] sm:$0xff] }
 0x1e1   :  { %v288_v23 = vsel %vm272_vm9, %v1116_v41, 128.0  ;;  %v287_v24 = vsel %vm271_vm10, %v1116_v41, 128.0 }
 0x1e2   :  { %311 = vmin.xlane.f32.xlu0 %v288_v23  ;;  %309 = vmin.xlane.f32.xlu1 %v287_v24 }
 0x1e3   :  { %v252_v25 = vpop.xlane.xlu1 %251  ;;  %v250_v26 = vpop.xlane.xlu0 %249 }
 0x1e4   :  { %vm274_vm11 = vcmp.ge.f32.partialorder %v1175_v47, %v252_v25  ;;  %vm273_vm12 = vcmp.ge.f32.partialorder %v1179_v48, %v250_v26  ;;  %v395_v47 = vmul.f32 1.442695, %v1265_v43  ;;  %v1336_v25 = vcvt.s32.f32 %v46_v61 }
 0x1e5   :  { %v290_v27 = vsel %vm274_vm11, %v1116_v41, 128.0  ;;  %v289_v28 = vsel %vm273_vm12, %v1116_v41, 128.0  ;;  %v1339_v26 = vcvt.s32.f32 %v47_v6 }
 0x1e6   :  { %315 = vmin.xlane.f32.xlu0 %v290_v27  ;;  %313 = vmin.xlane.f32.xlu1 %v289_v28  ;;  %893 = vpow2.f32 %v395_v47  ;;  %v426_v27 = vld [vmem:[%s1759_s4 + $0x40] sm:$0xff]  ;;  %v1351_v28 = vcvt.s32.f32 %v48_v11  ;;  %v432_v47 = vld [vmem:[%s1759_s4 + $0x70] sm:$0xff] }
 0x1e7   :  { %v256_v29 = vpop.xlane.xlu1 %255  ;;  %v254_v30 = vpop.xlane.xlu0 %253 }
 0x1e8   :  { %vm276_vm13 = vcmp.ge.f32.partialorder %v1188_v5, %v256_v29  ;;  %vm275_vm14 = vcmp.ge.f32.partialorder %v1192_v55, %v254_v30  ;;  %v40_v5 = vadd.s32 40, %v1109_v22  ;;  %v41_v55 = vadd.s32 48, %v1109_v22 }
 0x1e9   :  { %v292_v31 = vsel %vm276_vm13, %v1116_v41, 128.0  ;;  %v291_v32 = vsel %vm275_vm14, %v1116_v41, 128.0  ;;  %v1353_v29 = vcvt.s32.f32 %v49_v13  ;;  %v1355_v30 = vcvt.s32.f32 %v50_v16 }
 0x1ea   :  { %319 = vmin.xlane.f32.xlu0 %v292_v31  ;;  %317 = vmin.xlane.f32.xlu1 %v291_v32  ;;  %v1315_v62 = vcvt.s32.f32 %v40_v5  ;;  %v1317_v63 = vcvt.s32.f32 %v41_v55  ;;  %v427_v31 = vld [vmem:[%s1759_s4 + $0x48] sm:$0xff]  ;;  %v428_v32 = vld [vmem:[%s1759_s4 + $0x50] sm:$0xff]  ;;  %vm472_vm13 = vcmask 7168  }
 0x1eb   :  { %v260_v33 = vpop.xlane.xlu1 %259  ;;  %v258_v34 = vpop.xlane.xlu0 %257 }
 0x1ec   :  { %vm278_vm15 = vcmp.ge.f32.partialorder %v1203_v59, %v260_v33  ;;  %vm277_vm1 = vcmp.ge.f32.partialorder %v1207_v60, %v258_v34  ;;  %v44_v59 = vadd.s32 72, %v1109_v22  ;;  %v45_v60 = vadd.s32 80, %v1109_v22  ;;  %v429_v33 = vld [vmem:[%s1759_s4 + $0x58] sm:$0xff] }
 0x1ed   :  { %v294_v1 = vsel %vm278_vm15, %v1116_v41, 128.0  ;;  %v293_v36 = vsel %vm277_vm1, %v1116_v41, 128.0  ;;  %v1321_v22 = vcvt.s32.f32 %v43_v57 }
 0x1ee   :  { %323 = vmin.xlane.f32.xlu0 %v294_v1  ;;  %321 = vmin.xlane.f32.xlu1 %v293_v36  ;;  %v1332_v23 = vcvt.s32.f32 %v44_v59  ;;  %v1334_v24 = vcvt.s32.f32 %v45_v60 }
 0x1ef   :  { %v264_v37 = vpop.xlane.xlu1 %263  ;;  %v262_v38 = vpop.xlane.xlu0 %261 }
 0x1f0   :  { %vm280_vm2 = vcmp.ge.f32.partialorder %v1216_v3, %v264_v37  ;;  %vm279_vm3 = vcmp.ge.f32.partialorder %v1220_v4, %v262_v38  ;;  %v1289_v3 = vcvt.s32.f32 %v36_v51  ;;  %v1291_v4 = vcvt.s32.f32 %v37_v52 }
 0x1f1   :  { %v296_v40 = vsel %vm280_vm2, %v1116_v41, 128.0  ;;  %v295_v42 = vsel %vm279_vm3, %v1116_v41, 128.0 }
 0x1f2   :  { %327 = vmin.xlane.f32.xlu0 %v296_v40  ;;  %325 = vmin.xlane.f32.xlu1 %v295_v42 }
 0x1f3   :  { %v630_v44 = vpop.xlane.xlu0 %629  ;;  %v894_v48 = vpop.eup %893 }
 0x1f4   :  { %vm631_vm4 = vcmp.ge.f32.partialorder %v1226_v7, %v630_v44  ;;  %v397_v49 = vadd.f32 1.0, %v894_v48  ;;  %v1293_v7 = vcvt.s32.f32 %v38_v53  ;;  %v433_v48 = vld [vmem:[%s1759_s4 + $0x78] sm:$0xff] }
 0x1f5   :  { %v632_v45 = vsel %vm631_vm4, %v1116_v41, 128.0 }
 0x1f6   :  { %v633_v46 = vsel %vm70_vm0, %v632_v45, inf  ;;  %895 = vrcp.f32 %v397_v49  ;;  %v430_v45 = vld [vmem:[%s1759_s4 + $0x60] sm:$0xff] }
 0x1f7   :  { %634 = vmin.xlane.f32.xlu1 %v633_v46  ;;  %v431_v46 = vld [vmem:[%s1759_s4 + $0x68] sm:$0xff] }
 0x203   :  { %v896_v50 = vpop.eup %895 }
 0x204   :  { %v1280_v58 = vrot.slane %v896_v50, %v1112_v35 }
 0x206   :  { %vm440_vm5 = vcmp.lt.f32.partialorder %v418_v8, %v1280_v58  ;;  %vm441_vm6 = vcmp.lt.f32.partialorder %v419_v10, %v1280_v58  ;;  %vm442_vm7 = vcmp.lt.f32.partialorder %v420_v2, %v1280_v58  ;;  %vm443_vm8 = vcmp.lt.f32.partialorder %v421_v18, %v1280_v58 }
 0x207   :  { %vm444_vm9 = vcmp.lt.f32.partialorder %v422_v19, %v1280_v58  ;;  %vm445_vm10 = vcmp.lt.f32.partialorder %v423_v21, %v1280_v58  ;;  %vm446_vm11 = vcmp.lt.f32.partialorder %v424_v14, %v1280_v58  ;;  %vm447_vm12 = vcmp.lt.f32.partialorder %v425_v15, %v1280_v58 }
 0x208   :  { %v456_v34 = vsel %vm440_vm5, %v1286_v0, 128.0  ;;  %v457_v1 = vsel %vm441_vm6, %v1289_v3, 128.0  ;;  %v458_v36 = vsel %vm442_vm7, %v1291_v4, 128.0  ;;  %v459_v37 = vsel %vm443_vm8, %v1293_v7, 128.0 }
 0x209   :  { %v460_v38 = vsel %vm444_vm9, %v1304_v17, 128.0  ;;  %v461_v40 = vsel %vm445_vm10, %v1315_v62, 128.0  ;;  %v462_v42 = vsel %vm446_vm11, %v1317_v63, 128.0  ;;  %v463_v44 = vsel %vm447_vm12, %v1319_v20, 128.0 }
 0x20a   :  { %vm448_vm14 = vcmp.lt.f32.partialorder %v426_v27, %v1280_v58  ;;  %vm449_vm15 = vcmp.lt.f32.partialorder %v427_v31, %v1280_v58  ;;  %vm450_vm1 = vcmp.lt.f32.partialorder %v428_v32, %v1280_v58  ;;  %vm451_vm2 = vcmp.lt.f32.partialorder %v429_v33, %v1280_v58 }
 0x20b   :  { %v473_v49 = vsel %vm472_vm13, %v456_v34, inf  ;;  %v474_v50 = vsel %vm472_vm13, %v457_v1, inf  ;;  %v475_v51 = vsel %vm472_vm13, %v458_v36, inf  ;;  %v476_v52 = vsel %vm472_vm13, %v459_v37, inf }
 0x20c   :  { %v477_v53 = vsel %vm472_vm13, %v460_v38, inf  ;;  %v479_v54 = vsel %vm472_vm13, %v461_v40, inf  ;;  %v481_v5 = vsel %vm472_vm13, %v462_v42, inf  ;;  %v483_v55 = vsel %vm472_vm13, %v463_v44, inf }
 0x20d   :  { %v464_v56 = vsel %vm448_vm14, %v1321_v22, 128.0  ;;  %v465_v57 = vsel %vm449_vm15, %v1332_v23, 128.0  ;;  %v466_v59 = vsel %vm450_vm1, %v1334_v24, 128.0  ;;  %v467_v60 = vsel %vm451_vm2, %v1336_v25, 128.0 }
 0x20e   :  { %vm452_vm3 = vcmp.lt.f32.partialorder %v430_v45, %v1280_v58  ;;  %vm453_vm4 = vcmp.lt.f32.partialorder %v431_v46, %v1280_v58  ;;  %vm454_vm5 = vcmp.lt.f32.partialorder %v432_v47, %v1280_v58  ;;  %vm455_vm6 = vcmp.lt.f32.partialorder %v433_v48, %v1280_v58 }
 0x20f   :  { %v478_v61 = vmin.f32 %v473_v49, %v477_v53  ;;  %v480_v6 = vmin.f32 %v474_v50, %v479_v54  ;;  %v482_v8 = vmin.f32 %v475_v51, %v481_v5  ;;  %v484_v10 = vmin.f32 %v476_v52, %v483_v55 }
 0x210   :  { %v485_v11 = vsel %vm472_vm13, %v464_v56, inf  ;;  %v487_v13 = vsel %vm472_vm13, %v465_v57, inf  ;;  %v489_v16 = vsel %vm472_vm13, %v466_v59, inf  ;;  %v491_v2 = vsel %vm472_vm13, %v467_v60, inf }
 0x211   :  { %v468_v18 = vsel %vm452_vm3, %v1339_v26, 128.0  ;;  %v469_v19 = vsel %vm453_vm4, %v1351_v28, 128.0  ;;  %v470_v21 = vsel %vm454_vm5, %v1353_v29, 128.0  ;;  %v471_v58 = vsel %vm455_vm6, %v1355_v30, 128.0 }
 0x212   :  { %v486_v14 = vmin.f32 %v478_v61, %v485_v11  ;;  %v488_v15 = vmin.f32 %v480_v6, %v487_v13  ;;  %v490_v27 = vmin.f32 %v482_v8, %v489_v16  ;;  %v492_v31 = vmin.f32 %v484_v10, %v491_v2 }
 0x213   :  { %v493_v32 = vsel %vm472_vm13, %v468_v18, inf  ;;  %v495_v33 = vsel %vm472_vm13, %v469_v19, inf  ;;  %v497_v34 = vsel %vm472_vm13, %v470_v21, inf  ;;  %v499_v1 = vsel %vm472_vm13, %v471_v58, inf }
 0x214   :  { %v494_v36 = vmin.f32 %v486_v14, %v493_v32  ;;  %v496_v37 = vmin.f32 %v488_v15, %v495_v33  ;;  %v498_v38 = vmin.f32 %v490_v27, %v497_v34  ;;  %v500_v40 = vmin.f32 %v492_v31, %v499_v1 }
 0x216   :  { %v501_v42 = vmin.f32 %v494_v36, %v496_v37  ;;  %v502_v44 = vmin.f32 %v498_v38, %v500_v40 }
 0x218   :  { %v503_v45 = vmin.f32 %v501_v42, %v502_v44 }
 0x21a   :  { %v504_v46 = vrot.slane %v503_v45, 4 }
 0x21c   :  { %v505_v47 = vmin.f32 %v503_v45, %v504_v46 }
 0x21e   :  { %v506_v48 = vrot.slane %v505_v47, 2 }
 0x220   :  { %v507_v49 = vmin.f32 %v505_v47, %v506_v48 }
 0x222   :  { %v508_v50 = vrot.slane %v507_v49, 1 }
 0x224   :  { %v1420_v51 = vmin.f32 %v507_v49, %v508_v50 }
 0x226   :  { %v510_v52 = vadd.f32 1.0, %v1420_v51 }
 0x228   :  { %v1423_v53 = vmin.f32 %v510_v52, 128.0 }
 0x22a   :  { %vm513_vm9 = vcmp.lt.f32.partialorder %v1289_v3, %v1423_v53  ;;  %vm512_vm10 = vcmp.lt.f32.partialorder %v1286_v0, %v1423_v53  ;;  %vm515_vm14 = vcmp.lt.f32.partialorder %v1293_v7, %v1423_v53  ;;  %vm514_vm15 = vcmp.lt.f32.partialorder %v1291_v4, %v1423_v53 }
 0x22b   :  { %vm517_vm3 = vcmp.lt.f32.partialorder %v1315_v62, %v1423_v53  ;;  %vm516_vm4 = vcmp.lt.f32.partialorder %v1304_v17, %v1423_v53 }
 0x25f   :  { %v298_v54 = vpop.xlane.xlu1 %297  ;;  %v300_v5 = vpop.xlane.xlu0 %299 }
 0x260   :  { %v778_v55 = vtrunc.f32 %v298_v54  ;;  %v780_v56 = vtrunc.f32 %v300_v5  ;;  %vm329_vm7 = vcmp.eq.f32.partialorder %v1116_v41, %v298_v54  ;;  %vm330_vm8 = vcmp.eq.f32.partialorder %v1116_v41, %v300_v5 }
 0x261   :  { %v345_v57 = vsel %vm329_vm7, %v1120_v9, 0.0  ;;  %v346_v59 = vsel %vm330_vm8, %v1120_v9, 0.0  ;;  %vm519_vm7 = vcmp.lt.f32.partialorder %v1319_v20, %v1423_v53  ;;  %vm518_vm8 = vcmp.lt.f32.partialorder %v1317_v63, %v1423_v53 }
 0x262   :  { %v779_v60 = vcvt.f32.s32 %v778_v55  ;;  %v781_v61 = vcvt.f32.s32 %v780_v56  ;;  %361 = vadd.xlane.f32.xlu0 %v345_v57  ;;  %363 = vadd.xlane.f32.xlu1 %v346_v59 }
 0x263   :  { %v302_v6 = vpop.xlane.xlu1 %301  ;;  %v304_v8 = vpop.xlane.xlu0 %303 }
 0x264   :  { %v782_v10 = vtrunc.f32 %v302_v6  ;;  %v784_v11 = vtrunc.f32 %v304_v8  ;;  %vm331_vm11 = vcmp.eq.f32.partialorder %v1116_v41, %v302_v6  ;;  %vm332_vm12 = vcmp.eq.f32.partialorder %v1116_v41, %v304_v8 }
 0x265   :  { %v347_v13 = vsel %vm331_vm11, %v1120_v9, 0.0  ;;  %v348_v16 = vsel %vm332_vm12, %v1120_v9, 0.0  ;;  %v658_v2 = vsel %vm513_vm9, %v781_v61, 4294967295  ;;  %v657_v18 = vsel %vm512_vm10, %v779_v60, 4294967295 }
 0x266   :  { %v783_v19 = vcvt.f32.s32 %v782_v10  ;;  %v785_v21 = vcvt.f32.s32 %v784_v11  ;;  %365 = vadd.xlane.f32.xlu0 %v347_v13  ;;  %367 = vadd.xlane.f32.xlu1 %v348_v16  ;;  %674 = vst.msk [vmem:[%s1761_s6 + $0x8] sm:$0xff] %vm472_vm13, %v658_v2  ;;  %673 = vst.msk [vmem:[%s1761_s6] sm:$0xff] %vm472_vm13, %v657_v18 }
 0x267   :  { %v306_v58 = vpop.xlane.xlu1 %305  ;;  %v308_v14 = vpop.xlane.xlu0 %307 }
 0x268   :  { %v786_v15 = vtrunc.f32 %v306_v58  ;;  %v788_v27 = vtrunc.f32 %v308_v14  ;;  %vm333_vm1 = vcmp.eq.f32.partialorder %v1116_v41, %v306_v58  ;;  %vm334_vm2 = vcmp.eq.f32.partialorder %v1116_v41, %v308_v14 }
 0x269   :  { %v349_v31 = vsel %vm333_vm1, %v1120_v9, 0.0  ;;  %v350_v32 = vsel %vm334_vm2, %v1120_v9, 0.0  ;;  %v660_v33 = vsel %vm515_vm14, %v785_v21, 4294967295  ;;  %v659_v34 = vsel %vm514_vm15, %v783_v19, 4294967295 }
 0x26a   :  { %v787_v1 = vcvt.f32.s32 %v786_v15  ;;  %v789_v36 = vcvt.f32.s32 %v788_v27  ;;  %369 = vadd.xlane.f32.xlu0 %v349_v31  ;;  %371 = vadd.xlane.f32.xlu1 %v350_v32  ;;  %676 = vst.msk [vmem:[%s1761_s6 + $0x18] sm:$0xff] %vm472_vm13, %v660_v33  ;;  %675 = vst.msk [vmem:[%s1761_s6 + $0x10] sm:$0xff] %vm472_vm13, %v659_v34  ;;  %vm1768_vm1 = vcmp.lt.f32.partialorder %v1332_v23, %v1423_v53 }
 0x26b   :  { %v310_v37 = vpop.xlane.xlu1 %309  ;;  %v312_v38 = vpop.xlane.xlu0 %311  ;;  %vm1766_vm2 = vcmp.lt.f32.partialorder %v1321_v22, %v1423_v53 }
 0x26c   :  { %v790_v40 = vtrunc.f32 %v310_v37  ;;  %v792_v42 = vtrunc.f32 %v312_v38  ;;  %vm335_vm5 = vcmp.eq.f32.partialorder %v1116_v41, %v310_v37  ;;  %vm336_vm6 = vcmp.eq.f32.partialorder %v1116_v41, %v312_v38 }
 0x26d   :  { %v351_v44 = vsel %vm335_vm5, %v1120_v9, 0.0  ;;  %v352_v45 = vsel %vm336_vm6, %v1120_v9, 0.0  ;;  %v662_v46 = vsel %vm517_vm3, %v789_v36, 4294967295  ;;  %v661_v47 = vsel %vm516_vm4, %v787_v1, 4294967295 }
 0x26e   :  { %v793_v48 = vcvt.f32.s32 %v792_v42  ;;  %373 = vadd.xlane.f32.xlu0 %v351_v44  ;;  %375 = vadd.xlane.f32.xlu1 %v352_v45  ;;  %678 = vst.msk [vmem:[%s1761_s6 + $0x28] sm:$0xff] %vm472_vm13, %v662_v46  ;;  %677 = vst.msk [vmem:[%s1761_s6 + $0x20] sm:$0xff] %vm472_vm13, %v661_v47  ;;  %v791_v49 = vcvt.f32.s32 %v790_v40 }
 0x26f   :  { %v314_v50 = vpop.xlane.xlu1 %313  ;;  %v316_v52 = vpop.xlane.xlu0 %315 }
 0x270   :  { %v794_v54 = vtrunc.f32 %v314_v50  ;;  %v796_v5 = vtrunc.f32 %v316_v52  ;;  %vm337_vm11 = vcmp.eq.f32.partialorder %v1116_v41, %v314_v50  ;;  %vm338_vm12 = vcmp.eq.f32.partialorder %v1116_v41, %v316_v52 }
 0x271   :  { %v353_v55 = vsel %vm337_vm11, %v1120_v9, 0.0  ;;  %v354_v56 = vsel %vm338_vm12, %v1120_v9, 0.0  ;;  %v664_v59 = vsel %vm519_vm7, %v793_v48, 4294967295  ;;  %v663_v8 = vsel %vm518_vm8, %v791_v49, 4294967295 }
 0x272   :  { %v797_v57 = vcvt.f32.s32 %v796_v5  ;;  %377 = vadd.xlane.f32.xlu0 %v353_v55  ;;  %379 = vadd.xlane.f32.xlu1 %v354_v56  ;;  %v795_v60 = vcvt.f32.s32 %v794_v54  ;;  %680 = vst.msk [vmem:[%s1761_s6 + $0x38] sm:$0xff] %vm472_vm13, %v664_v59  ;;  %679 = vst.msk [vmem:[%s1761_s6 + $0x30] sm:$0xff] %vm472_vm13, %v663_v8  ;;  %vm1765_vm11 = vcmp.lt.f32.partialorder %v1336_v25, %v1423_v53 }
 0x273   :  { %v318_v61 = vpop.xlane.xlu1 %317  ;;  %v320_v6 = vpop.xlane.xlu0 %319  ;;  %vm1767_vm12 = vcmp.lt.f32.partialorder %v1334_v24, %v1423_v53 }
 0x274   :  { %v798_v10 = vtrunc.f32 %v318_v61  ;;  %v800_v11 = vtrunc.f32 %v320_v6  ;;  %vm339_vm5 = vcmp.eq.f32.partialorder %v1116_v41, %v318_v61  ;;  %vm340_vm6 = vcmp.eq.f32.partialorder %v1116_v41, %v320_v6 }
 0x275   :  { %v355_v13 = vsel %vm339_vm5, %v1120_v9, 0.0  ;;  %v356_v16 = vsel %vm340_vm6, %v1120_v9, 0.0  ;;  %v666_v18 = vsel %vm1768_vm1, %v797_v57, 4294967295  ;;  %v665_v14 = vsel %vm1766_vm2, %v795_v60, 4294967295 }
 0x276   :  { %v801_v2 = vcvt.f32.s32 %v800_v11  ;;  %381 = vadd.xlane.f32.xlu0 %v355_v13  ;;  %383 = vadd.xlane.f32.xlu1 %v356_v16  ;;  %v799_v19 = vcvt.f32.s32 %v798_v10  ;;  %682 = vst.msk [vmem:[%s1761_s6 + $0x48] sm:$0xff] %vm472_vm13, %v666_v18  ;;  %681 = vst.msk [vmem:[%s1761_s6 + $0x40] sm:$0xff] %vm472_vm13, %v665_v14  ;;  %vm1770_vm1 = vcmp.lt.f32.partialorder %v1353_v29, %v1423_v53 }
 0x277   :  { %v322_v21 = vpop.xlane.xlu1 %321  ;;  %v324_v58 = vpop.xlane.xlu0 %323 }
 0x278   :  { %v802_v15 = vtrunc.f32 %v322_v21  ;;  %v804_v27 = vtrunc.f32 %v324_v58  ;;  %vm341_vm5 = vcmp.eq.f32.partialorder %v1116_v41, %v322_v21  ;;  %vm342_vm6 = vcmp.eq.f32.partialorder %v1116_v41, %v324_v58 }
 0x279   :  { %v357_v31 = vsel %vm341_vm5, %v1120_v9, 0.0  ;;  %v358_v32 = vsel %vm342_vm6, %v1120_v9, 0.0  ;;  %v668_v34 = vsel %vm1765_vm11, %v801_v2, 4294967295  ;;  %v667_v38 = vsel %vm1767_vm12, %v799_v19, 4294967295 }
 0x27a   :  { %v805_v33 = vcvt.f32.s32 %v804_v27  ;;  %385 = vadd.xlane.f32.xlu0 %v357_v31  ;;  %387 = vadd.xlane.f32.xlu1 %v358_v32  ;;  %v803_v1 = vcvt.f32.s32 %v802_v15  ;;  %684 = vst.msk [vmem:[%s1761_s6 + $0x58] sm:$0xff] %vm472_vm13, %v668_v34  ;;  %vm525_vm5 = vcmp.lt.f32.partialorder %v1351_v28, %v1423_v53  ;;  %vm524_vm6 = vcmp.lt.f32.partialorder %v1339_v26, %v1423_v53 }
 0x27b   :  { %v326_v36 = vpop.xlane.xlu1 %325  ;;  %v328_v37 = vpop.xlane.xlu0 %327  ;;  %683 = vst.msk [vmem:[%s1761_s6 + $0x50] sm:$0xff] %vm472_vm13, %v667_v38  ;;  %vm527_vm12 = vcmp.lt.f32.partialorder %v1355_v30, %v1423_v53 }
 0x27c   :  { %v806_v40 = vtrunc.f32 %v326_v36  ;;  %v808_v42 = vtrunc.f32 %v328_v37  ;;  %vm343_vm11 = vcmp.eq.f32.partialorder %v1116_v41, %v326_v36  ;;  %vm344_vm2 = vcmp.eq.f32.partialorder %v1116_v41, %v328_v37 }
 0x27d   :  { %v359_v44 = vsel %vm343_vm11, %v1120_v9, 0.0  ;;  %v360_v45 = vsel %vm344_vm2, %v1120_v9, 0.0  ;;  %v670_v48 = vsel %vm525_vm5, %v805_v33, 4294967295  ;;  %v669_v9 = vsel %vm524_vm6, %v803_v1, 4294967295 }
 0x27e   :  { %v807_v46 = vcvt.f32.s32 %v806_v40  ;;  %v809_v47 = vcvt.f32.s32 %v808_v42  ;;  %389 = vadd.xlane.f32.xlu0 %v359_v44  ;;  %391 = vadd.xlane.f32.xlu1 %v360_v45  ;;  %686 = vst.msk [vmem:[%s1761_s6 + $0x68] sm:$0xff] %vm472_vm13, %v670_v48  ;;  %685 = vst.msk [vmem:[%s1761_s6 + $0x60] sm:$0xff] %vm472_vm13, %v669_v9  ;;  %vm1769_vm11 = vcmask 0  }
 0x280   :  { %v635_v49 = vpop.xlane.xlu1 %634  ;;  %v672_v50 = vsel %vm527_vm12, %v809_v47, 4294967295  ;;  %v671_v52 = vsel %vm1770_vm1, %v807_v46, 4294967295 }
 0x281   :  { %vm636_vm2 = vcmp.eq.f32.partialorder %v1116_v41, %v635_v49  ;;  %v812_v54 = vtrunc.f32 %v635_v49  ;;  %688 = vst.msk [vmem:[%s1761_s6 + $0x78] sm:$0xff] %vm472_vm13, %v672_v50  ;;  %687 = vst.msk [vmem:[%s1761_s6 + $0x70] sm:$0xff] %vm472_vm13, %v671_v52  ;;  %v810_v41 = vtrunc.f32 %v1423_v53 }
 0x282   :  { %v637_v5 = vsel %vm636_vm2, %v1199_v12, 0.0 }
 0x283   :  { %v813_v55 = vcvt.f32.s32 %v812_v54  ;;  %v638_v56 = vsel %vm70_vm0, %v637_v5, 0.0 }
 0x284   :  { %639 = vadd.xlane.f32.xlu0 %v638_v56 }
 0x285   :  { %693 = vst.msk [vmem:[#allocation5] sm:$0x1] %vm1769_vm11, %v813_v55 }
 0x286   :  { %916 = shalt.err (!%p913_p4)
}
 0x287   :  { %754 = dma.vmem_to_hbm [thread:$0]  %s752_s10, 16, %s1763_s8, [#allocation6]   ;;  %v811_v12 = vcvt.f32.s32 %v810_v41 }
 0x288   :  { %s970_s14 = smov [#allocation3]  }
 0x289   :  { %s741_s0 = sshll.u32 %s970_s14, 4  ;;  %691 = vst.msk [vmem:[#allocation3] sm:$0x1] %vm1769_vm11, %v811_v12  ;;  %s742_s0 = int_to_ptr.vmem [resolvable:$true] %s741_s0 }
 0x28a   :  { %s925_s1 = scalar_lea.vmem %s742_s0, 16  ;;  %s929_s2 = scalar_lea.vmem %s742_s0, 32 }
 0x28b   :  { %p926_p5 = scmp.ne.s32.totalorder %s742_s0, %s925_s1  ;;  %p930_p6 = scmp.lt.s32.totalorder %s742_s0, %s742_s0 }
 0x28c   :  { %p931_p7 = scmp.lt.s32.totalorder %s929_s2, %s925_s1 }
 0x28e   :  { %p932_p8 = por %p931_p7, %p930_p6 }
 0x290   :  { %p933_p9 = pnand %p932_p8, %p926_p5 }
 0x292   :  { %936 = shalt.err (!%p933_p9)
}
 0x293   :  { %744 = dma.vmem_to_hbm [thread:$0]  %s742_s0, 16, %s1762_s7, [#allocation4]   ;;  %v401_v57 = vand.u32 2147483647, %v1258_v39  ;;  %v410_v59 = vand.u32 2147483647, %v1265_v43  ;;  %vm529_vm0 = vcmp.eq.f32.partialorder %v1289_v3, %v1420_v51  ;;  %vm528_vm2 = vcmp.eq.f32.partialorder %v1286_v0, %v1420_v51 }
 0x294   :  { %v400_v19 = vmin.f32 %v1258_v39, 0.0  ;;  %v409_v58 = vmin.f32 %v1265_v43, 0.0  ;;  %vm531_vm11 = vcmp.eq.f32.partialorder %v1293_v7, %v1420_v51  ;;  %vm530_vm1 = vcmp.eq.f32.partialorder %v1291_v4, %v1420_v51  ;;  %s971_s7 = smov [#allocation7]  }
 0x295   :  { %v402_v60 = vsub.f32 0.0, %v401_v57  ;;  %v411_v61 = vsub.f32 0.0, %v410_v59  ;;  %s761_s8 = sshll.u32 %s971_s7, 4  ;;  %s762_s8 = int_to_ptr.vmem [resolvable:$true] %s761_s8 }
 0x296   :  { %s945_s17 = scalar_lea.vmem %s762_s8, 16  ;;  %s949_s18 = scalar_lea.vmem %s762_s8, 32 }
 0x297   :  { %v403_v6 = vmul.f32 1.442695, %v402_v60  ;;  %v412_v8 = vmul.f32 1.442695, %v411_v61  ;;  %p946_p10 = scmp.ne.s32.totalorder %s762_s8, %s945_s17  ;;  %p950_p11 = scmp.lt.s32.totalorder %s762_s8, %s762_s8 }
 0x298   :  { %p951_p12 = scmp.lt.s32.totalorder %s949_s18, %s945_s17 }
 0x299   :  { %897 = vpow2.f32 %v403_v6 }
 0x29a   :  { %899 = vpow2.f32 %v412_v8  ;;  %p952_p13 = por %p951_p12, %p950_p11 }
 0x29c   :  { %p953_p0 = pnand %p952_p13, %p946_p10 }
 0x2a6   :  { %v898_v10 = vpop.eup %897 }
 0x2a7   :  { %v900_v11 = vpop.eup %899  ;;  %v405_v13 = vadd.f32 1.0, %v898_v10 }
 0x2a8   :  { %v414_v16 = vadd.f32 1.0, %v900_v11 }
 0x2a9   :  { %901 = vlog2.f32 %v405_v13 }
 0x2aa   :  { %903 = vlog2.f32 %v414_v16 }
 0x2b6   :  { %v902_v2 = vpop.eup %901 }
 0x2b7   :  { %v904_v18 = vpop.eup %903  ;;  %v407_v21 = vmul.f32 0.6931472, %v902_v2 }
 0x2b8   :  { %v416_v14 = vmul.f32 0.6931472, %v904_v18 }
 0x2b9   :  { %v408_v15 = vsub.f32 %v400_v19, %v407_v21 }
 0x2ba   :  { %v417_v27 = vsub.f32 %v409_v58, %v416_v14 }
 0x2bb   :  { %v1618_v31 = vrot.slane %v408_v15, %v1112_v35 }
 0x2bc   :  { %v1621_v32 = vrot.slane %v417_v27, %v1112_v35 }
 0x2be   :  { %v557_v39 = vsel %vm529_vm0, %v1618_v31, %v1621_v32  ;;  %v556_v43 = vsel %vm528_vm2, %v1618_v31, %v1621_v32  ;;  %v559_v36 = vsel %vm531_vm11, %v1618_v31, %v1621_v32  ;;  %v558_v37 = vsel %vm530_vm1, %v1618_v31, %v1621_v32 }
 0x2bf   :  { %vm533_vm0 = vcmp.eq.f32.partialorder %v1315_v62, %v1420_v51  ;;  %vm532_vm2 = vcmp.eq.f32.partialorder %v1304_v17, %v1420_v51  ;;  %vm1772_vm1 = vcmp.lt.f32.partialorder %v1321_v22, %v1423_v53  ;;  %vm540_vm11 = vcmp.eq.f32.partialorder %v1339_v26, %v1420_v51 }
 0x2c0   :  { %v561_v3 = vsel %vm533_vm0, %v1618_v31, %v1621_v32  ;;  %v560_v0 = vsel %vm532_vm2, %v1618_v31, %v1621_v32  ;;  %vm543_vm0 = vcmp.eq.f32.partialorder %v1355_v30, %v1420_v51  ;;  %vm1773_vm2 = vcmp.lt.f32.partialorder %v1336_v25, %v1423_v53 }
 0x2eb   :  { %v364_v35 = vpop.xlane.xlu1 %363  ;;  %v362_v33 = vpop.xlane.xlu0 %361 }
 0x2ec   :  { %v573_v34 = vadd.f32 %v557_v39, %v364_v35  ;;  %v572_v1 = vadd.f32 %v556_v43, %v362_v33 }
 0x2ee   :  { %v589_v38 = vsel %vm513_vm9, %v573_v34, 0.0  ;;  %v588_v40 = vsel %vm512_vm10, %v572_v1, 0.0  ;;  %vm535_vm9 = vcmp.eq.f32.partialorder %v1319_v20, %v1420_v51  ;;  %vm534_vm10 = vcmp.eq.f32.partialorder %v1317_v63, %v1420_v51 }
 0x2ef   :  { %v695_v42 = vsel %vm472_vm13, %v589_v38, 0.0  ;;  %v694_v44 = vsel %vm472_vm13, %v588_v40, 0.0  ;;  %v368_v45 = vpop.xlane.xlu1 %367  ;;  %v366_v46 = vpop.xlane.xlu0 %365  ;;  %v563_v7 = vsel %vm535_vm9, %v1618_v31, %v1621_v32  ;;  %v562_v57 = vsel %vm534_vm10, %v1618_v31, %v1621_v32 }
 0x2f0   :  { %v575_v47 = vadd.f32 %v559_v36, %v368_v45  ;;  %v574_v48 = vadd.f32 %v558_v37, %v366_v46  ;;  %v696_v9 = vadd.f32 %v695_v42, %v694_v44  ;;  %v568_v45 = vsel %vm540_vm11, %v1618_v31, %v1621_v32 }
 0x2f1   :  { %vm1774_vm9 = vcmp.lt.f32.partialorder %v1334_v24, %v1423_v53  ;;  %vm542_vm10 = vcmp.eq.f32.partialorder %v1353_v29, %v1420_v51 }
 0x2f2   :  { %v591_v49 = vsel %vm515_vm14, %v575_v47, 0.0  ;;  %v590_v50 = vsel %vm514_vm15, %v574_v48, 0.0  ;;  %vm537_vm14 = vcmp.eq.f32.partialorder %v1332_v23, %v1420_v51  ;;  %vm536_vm15 = vcmp.eq.f32.partialorder %v1321_v22, %v1420_v51 }
 0x2f3   :  { %v697_v52 = vsel %vm472_vm13, %v590_v50, 0.0  ;;  %v372_v54 = vpop.xlane.xlu1 %371  ;;  %v370_v5 = vpop.xlane.xlu0 %369  ;;  %v699_v12 = vsel %vm472_vm13, %v591_v49, 0.0  ;;  %v565_v62 = vsel %vm537_vm14, %v1618_v31, %v1621_v32  ;;  %v564_v2 = vsel %vm536_vm15, %v1618_v31, %v1621_v32 }
 0x2f4   :  { %v698_v55 = vadd.f32 %v697_v52, %v696_v9  ;;  %v577_v56 = vadd.f32 %v561_v3, %v372_v54  ;;  %v576_v41 = vadd.f32 %v560_v0, %v370_v5  ;;  %v570_v54 = vsel %vm542_vm10, %v1618_v31, %v1621_v32 }
 0x2f6   :  { %v593_v4 = vsel %vm517_vm3, %v577_v56, 0.0  ;;  %v700_v59 = vadd.f32 %v699_v12, %v698_v55  ;;  %v592_v60 = vsel %vm516_vm4, %v576_v41, 0.0  ;;  %vm539_vm3 = vcmp.eq.f32.partialorder %v1336_v25, %v1420_v51 }
 0x2f7   :  { %v701_v61 = vsel %vm472_vm13, %v592_v60, 0.0  ;;  %v376_v6 = vpop.xlane.xlu1 %375  ;;  %v374_v8 = vpop.xlane.xlu0 %373  ;;  %v703_v16 = vsel %vm472_vm13, %v593_v4, 0.0  ;;  %vm538_vm4 = vcmp.eq.f32.partialorder %v1334_v24, %v1420_v51  ;;  %v567_v20 = vsel %vm539_vm3, %v1618_v31, %v1621_v32 }
 0x2f8   :  { %v702_v10 = vadd.f32 %v701_v61, %v700_v59  ;;  %v579_v11 = vadd.f32 %v563_v7, %v376_v6  ;;  %v578_v13 = vadd.f32 %v562_v57, %v374_v8  ;;  %v566_v35 = vsel %vm538_vm4, %v1618_v31, %v1621_v32 }
 0x2f9   :  { %v571_v25 = vsel %vm543_vm0, %v1618_v31, %v1621_v32 }
 0x2fa   :  { %v595_v17 = vsel %vm519_vm7, %v579_v11, 0.0  ;;  %v704_v18 = vadd.f32 %v703_v16, %v702_v10  ;;  %v594_v19 = vsel %vm518_vm8, %v578_v13, 0.0  ;;  %vm541_vm7 = vcmp.eq.f32.partialorder %v1351_v28, %v1420_v51 }
 0x2fb   :  { %v705_v21 = vsel %vm472_vm13, %v594_v19, 0.0  ;;  %v380_v58 = vpop.xlane.xlu1 %379  ;;  %v378_v14 = vpop.xlane.xlu0 %377  ;;  %v707_v43 = vsel %vm472_vm13, %v595_v17, 0.0  ;;  %vm1771_vm8 = vcmp.lt.f32.partialorder %v1332_v23, %v1423_v53  ;;  %v569_v23 = vsel %vm541_vm7, %v1618_v31, %v1621_v32 }
 0x2fc   :  { %v706_v15 = vadd.f32 %v705_v21, %v704_v18  ;;  %v581_v27 = vadd.f32 %v565_v62, %v380_v58  ;;  %v580_v39 = vadd.f32 %v564_v2, %v378_v14 }
 0x2fe   :  { %v597_v63 = vsel %vm1771_vm8, %v581_v27, 0.0  ;;  %v708_v33 = vadd.f32 %v707_v43, %v706_v15  ;;  %v596_v34 = vsel %vm1772_vm1, %v580_v39, 0.0 }
 0x2ff   :  { %v709_v1 = vsel %vm472_vm13, %v596_v34, 0.0  ;;  %v384_v36 = vpop.xlane.xlu1 %383  ;;  %v382_v37 = vpop.xlane.xlu0 %381  ;;  %v711_v44 = vsel %vm472_vm13, %v597_v63, 0.0 }
 0x300   :  { %v710_v38 = vadd.f32 %v709_v1, %v708_v33  ;;  %v583_v40 = vadd.f32 %v567_v20, %v384_v36  ;;  %v582_v42 = vadd.f32 %v566_v35, %v382_v37 }
 0x302   :  { %v599_v22 = vsel %vm1773_vm2, %v583_v40, 0.0  ;;  %v712_v46 = vadd.f32 %v711_v44, %v710_v38  ;;  %v598_v47 = vsel %vm1774_vm9, %v582_v42, 0.0 }
 0x303   :  { %v713_v48 = vsel %vm472_vm13, %v598_v47, 0.0  ;;  %v388_v3 = vpop.xlane.xlu1 %387  ;;  %v386_v0 = vpop.xlane.xlu0 %385  ;;  %v715_v52 = vsel %vm472_vm13, %v599_v22, 0.0 }
 0x304   :  { %v714_v9 = vadd.f32 %v713_v48, %v712_v46  ;;  %v585_v49 = vadd.f32 %v569_v23, %v388_v3  ;;  %v584_v50 = vadd.f32 %v568_v45, %v386_v0 }
 0x306   :  { %v601_v24 = vsel %vm525_vm5, %v585_v49, 0.0  ;;  %v716_v51 = vadd.f32 %v715_v52, %v714_v9  ;;  %v600_v5 = vsel %vm524_vm6, %v584_v50, 0.0  ;;  %vm1775_vm5 = vcmp.lt.f32.partialorder %v1353_v29, %v1423_v53 }
 0x307   :  { %v717_v55 = vsel %vm472_vm13, %v600_v5, 0.0  ;;  %v392_v56 = vpop.xlane.xlu1 %391  ;;  %v390_v41 = vpop.xlane.xlu0 %389  ;;  %v719_v4 = vsel %vm472_vm13, %v601_v24, 0.0 }
 0x308   :  { %v718_v12 = vadd.f32 %v717_v55, %v716_v51  ;;  %v587_v7 = vadd.f32 %v571_v25, %v392_v56  ;;  %v586_v57 = vadd.f32 %v570_v54, %v390_v41 }
 0x30a   :  { %v603_v31 = vsel %vm527_vm12, %v587_v7, 0.0  ;;  %v720_v28 = vadd.f32 %v719_v4, %v718_v12  ;;  %v602_v32 = vsel %vm1775_vm5, %v586_v57, 0.0  ;;  %vm1776_vm12 = vcmask 0  }
 0x30b   :  { %v721_v26 = vsel %vm472_vm13, %v602_v32, 0.0  ;;  %v723_v60 = vsel %vm472_vm13, %v603_v31, 0.0 }
 0x30c   :  { %v722_v59 = vadd.f32 %v721_v26, %v720_v28 }
 0x30d   :  { %v640_v16 = vpop.xlane.xlu0 %639 }
 0x30e   :  { %v724_v61 = vadd.f32 %v723_v60, %v722_v59 }
 0x310   :  { %v725_v6 = vrot.slane %v724_v61, 4 }
 0x312   :  { %v726_v8 = vadd.f32 %v725_v6, %v724_v61 }
 0x314   :  { %v727_v10 = vrot.slane %v726_v8, 2 }
 0x316   :  { %v728_v11 = vadd.f32 %v727_v10, %v726_v8 }
 0x318   :  { %v729_v13 = vrot.slane %v728_v11, 1 }
 0x31a   :  { %v730_v30 = vadd.f32 %v729_v13, %v728_v11 }
 0x31c   :  { %v731_v62 = vadd.f32 %v730_v30, %v640_v16 }
 0x31e   :  { %732 = vst.msk [vmem:[#allocation7] sm:$0x1] %vm1776_vm12, %v731_v62 }
 0x31f   :  { %956 = shalt.err (!%p953_p0)
}
 0x320   :  { %764 = dma.vmem_to_hbm [thread:$0]  %s762_s8, 16, %s1764_s9, [#allocation6]  }
 0x321   :  { %965 = dma.done.wait [#allocation4], 16  }
 0x322   :  { %966 = vsyncadd [#allocation4], 4294967280 }
 0x323   :  { %967 = dma.done.wait [#allocation6], 32  }
 0x324   :  { %968 = vsyncadd [#allocation6], 4294967264 }
 0x325   :  { %776 = vsyncpa [#allocation4], 1 }
 0x326   :  { %777 = vsyncpa [#allocation6], 1 }

</bundles_post_ra>
